<compile_context>
chip_gen: v7x
topology: tpu7x:2x2x1
jax: 0.10.0
libtpu: 0.0.40
codegen_flags: <defaults>
</compile_context>

<pallas_src>
import functools

import jax
import jax.numpy as jnp
from jax import lax
from jax.experimental import pallas as pl
from jax.experimental.pallas import tpu as pltpu


def _round_up(x: int, m: int) -> int:
    return -(-x // m) * m


# ---------------------------------------------------------------------------
# Kernels
# ---------------------------------------------------------------------------
def _row_sums(x_f32, hw_tile):
    """Lane-dense (1, row_tile) row sums of a (row_tile, hw_tile) f32 tile.

    Uses the MXU (q @ k.T pattern: contract the last dims of both operands),
    which leaves the VPU/XLU free and directly yields a lane-major result.
    """
    ones = jnp.ones((1, hw_tile), jnp.float32)
    return lax.dot_general(
        ones, x_f32,
        dimension_numbers=(((1,), (1,)), ((), ())),
        precision=lax.Precision.HIGHEST,
        preferred_element_type=jnp.float32)


def _gap_kernel_fast(x_ref, o_ref, *, inv_hw):
    """Full spatial extent in one block: one dot, one lane-dense store."""
    x = x_ref[...].astype(jnp.float32)                 # (row_tile, hw)
    s = _row_sums(x, x_ref.shape[-1])                  # (1, row_tile)
    o_ref[...] = (s * inv_hw).astype(o_ref.dtype)


def _gap_kernel_acc(x_ref, o_ref, acc_ref, *, inv_hw, hw, mask_tail):
    """Spatial extent split over grid axis 1; f32 lane-dense accumulation."""
    j = pl.program_id(1)
    hw_tile = x_ref.shape[-1]

    @pl.when(j == 0)
    def _():
        acc_ref[...] = jnp.zeros_like(acc_ref)

    x = x_ref[...].astype(jnp.float32)                 # (row_tile, hw_tile)
    if mask_tail:
        # Zero the tail columns of the (possibly partial) last spatial block
        # so stale VMEM never reaches the accumulator.
        col = lax.broadcasted_iota(jnp.int32, (1, hw_tile), 1)
        x = jnp.where(col + j * hw_tile < hw, x, 0.0)

    acc_ref[...] += _row_sums(x, hw_tile)

    @pl.when(j == pl.num_programs(1) - 1)
    def _():
        o_ref[...] = (acc_ref[...] * inv_hw).astype(o_ref.dtype)


# ---------------------------------------------------------------------------
# Tiling heuristics
# ---------------------------------------------------------------------------
def _target_block_bytes() -> int:
    """Generation-aware input-block target."""
    kind = ""
    try:
        kind = jax.devices()[0].device_kind.lower()
    except Exception:
        pass
    if "v5" in kind:
        # ~0.8 TB/s HBM: a 4 MiB block already hides the ~0.35 us step cost.
        return 4 << 20
    # v6e / v7x (and unknown): 8 MiB keeps per-step overhead < ~10% even at
    # v7x's ~3.2 TB/s HBM while staying well inside 64 MiB physical VMEM.
    return 8 << 20


def _vmem_ceiling_bytes() -> int:
    try:
        cap = int(pltpu.get_tpu_info().vmem_capacity_bytes)
    except Exception:
        cap = 64 << 20                      # conservative: v7x-sized VMEM
    return (48 << 20) if cap <= (64 << 20) else (96 << 20)


def _choose_tiles(rows, hw, itemsize, target_bytes):
    """Pick (row_tile, hw_tile) by *padded* VMEM footprint (lanes pad to 128)."""
    hw_pad = _round_up(hw, 128)
    sub = 8 if itemsize >= 4 else 32 // itemsize        # sublane packing granule

    if rows < 128:
        # Single (partial-width) block whose leading dim equals the array dim.
        row_tile = rows
    else:
        row_tile = (target_bytes // (hw_pad * itemsize)) // 128 * 128
        row_tile = max(128, row_tile)
        row_tile = min(row_tile, _round_up(rows, 128))
        # Keep >= ~4 row blocks: enables DMA/compute overlap and lets the
        # "parallel" axis shard across v7x's two TensorCores.
        row_tile = min(row_tile, max(128, _round_up(-(-rows // 4), 128)))

    row_eff = _round_up(row_tile, sub)
    hw_tile = hw                                        # common case: no split
    if row_eff * hw_pad * itemsize > target_bytes:
        # Even the minimal row tile is over budget: split H*W on grid axis 1.
        # Floor of 512 lanes keeps per-row DMA chunks >= 2 KiB.
        hw_tile = (target_bytes // (row_eff * itemsize)) // 128 * 128
        hw_tile = max(512, hw_tile)
        hw_tile = min(hw_tile, hw_pad)
        if hw_tile >= hw:
            hw_tile = hw
    return row_tile, hw_tile


# ---------------------------------------------------------------------------
# Wrapper
# ---------------------------------------------------------------------------
def global_avg_pool2d(x: jax.Array, *, target_block_bytes: int | None = None):
    """Equivalent of F.avg_pool2d(x, kernel_size=x.shape[2:]) for NCHW input."""
    n, c, h, w = x.shape
    rows = n * c
    hw = h * w
    itemsize = jnp.dtype(x.dtype).itemsize

    if target_block_bytes is None:
        target_block_bytes = _target_block_bytes()

    x2 = x.reshape(rows, hw)

    row_tile, hw_tile = _choose_tiles(rows, hw, itemsize, target_block_bytes)
    row_blocks = pl.cdiv(rows, row_tile)
    hw_blocks = pl.cdiv(hw, hw_tile)
    out_cols = row_blocks * row_tile        # lane-dense; >= rows, sliced below

    # Padded VMEM plan: 2x input + 2x output (+ accumulator), + headroom.
    sub = 8 if itemsize >= 4 else 32 // itemsize
    in_block = _round_up(row_tile, sub) * _round_up(hw_tile, 128) * itemsize
    out_block = 8 * _round_up(row_tile, 128) * 4        # (1, row_tile), generous
    acc_block = out_block if hw_blocks > 1 else 0
    plan = 2 * in_block + 2 * out_block + acc_block + (4 << 20)
    vmem_limit = int(min(_vmem_ceiling_bytes(), max(32 << 20, plan)))

    inv_hw = 1.0 / hw
    out_shape = jax.ShapeDtypeStruct((1, out_cols), x.dtype)

    if hw_blocks == 1:
        kernel = functools.partial(_gap_kernel_fast, inv_hw=inv_hw)
        grid_spec = pltpu.PrefetchScalarGridSpec(
            num_scalar_prefetch=0,
            grid=(row_blocks,),
            in_specs=[pl.BlockSpec((row_tile, hw_tile), lambda i: (i, 0))],
            out_specs=pl.BlockSpec((1, row_tile), lambda i: (0, i)),
        )
        dim_sem = ("parallel",)
    else:
        kernel = functools.partial(
            _gap_kernel_acc, inv_hw=inv_hw, hw=hw,
            mask_tail=(hw % hw_tile != 0))
        grid_spec = pltpu.PrefetchScalarGridSpec(
            num_scalar_prefetch=0,
            grid=(row_blocks, hw_blocks),
            in_specs=[pl.BlockSpec((row_tile, hw_tile), lambda i, j: (i, j))],
            out_specs=pl.BlockSpec((1, row_tile), lambda i, j: (0, i)),
            scratch_shapes=[pltpu.VMEM((1, row_tile), jnp.float32)],
        )
        dim_sem = ("parallel", "arbitrary")

    out = pl.pallas_call(
        kernel,
        out_shape=out_shape,
        grid_spec=grid_spec,
        compiler_params=pltpu.CompilerParams(
            dimension_semantics=dim_sem,
            vmem_limit_bytes=vmem_limit,
        ),
        cost_estimate=pl.CostEstimate(
            flops=2 * rows * hw,
            transcendentals=0,
            bytes_accessed=rows * hw * itemsize + rows * itemsize,
        ),
    )(x2)

    # Flat index in the (1, row_blocks*row_tile) output equals the global row
    # index, so any garbage from partial row blocks is sliced off here.
    return out.reshape(-1)[:rows].reshape(n, c, 1, 1)


# ---------------------------------------------------------------------------
# Self-test
# ---------------------------------------------------------------------------
if __name__ == "__main__":
    key = jax.random.PRNGKey(0)
    k0, k1, k2 = jax.random.split(key, 3)

    def make(k, shape):
        # bf16-representable values: keeps the check tight regardless of the
        # MXU pass count chosen for the f32 matmul.
        return jax.random.normal(k, shape, jnp.float32).astype(
            jnp.bfloat16).astype(jnp.float32)

    # 1) Main case (fast path, hw multiple of 128).
    x = make(k0, (2, 4, 16, 16))
    y = global_avg_pool2d(x)
    jax.block_until_ready(y)
    ref = jnp.mean(x, axis=(2, 3), keepdims=True)
    assert y.shape == (2, 4, 1, 1), y.shape
    assert jnp.allclose(y, ref, atol=1e-5, rtol=1e-5), "mismatch (fast path)"

    # 2) Partial row block, hw not a multiple of 128 (fast path).
    x2 = make(k1, (3, 5, 7, 7))
    y2 = global_avg_pool2d(x2)
    jax.block_until_ready(y2)
    ref2 = jnp.mean(x2, axis=(2, 3), keepdims=True)
    assert y2.shape == (3, 5, 1, 1), y2.shape
    assert jnp.allclose(y2, ref2, atol=1e-5, rtol=1e-5), "mismatch (partial rows)"

    # 3) Forced spatial split + tail masking (accumulator path), via a tiny
    #    block-byte target so the small test shape exercises the general path.
    x3 = make(k2, (2, 3, 32, 36))
    y3 = global_avg_pool2d(x3, target_block_bytes=64 * 1024)
    jax.block_until_ready(y3)
    ref3 = jnp.mean(x3, axis=(2, 3), keepdims=True)
    assert y3.shape == (2, 3, 1, 1), y3.shape
    assert jnp.allclose(y3, ref3, atol=1e-5, rtol=1e-5), "mismatch (split path)"

    print("KERNEL_OK")
</pallas_src>

<mosaic_0001>
module attributes {stable_mosaic.version = 11 : i64} {
  func.func @_gap_kernel_fast(%arg0: i32, %arg1: memref<8x256xf32, #tpu.memory_space<vmem>>, %arg2: memref<1x8xf32, #tpu.memory_space<vmem>>) attributes {dimension_semantics = [#tpu.dimension_semantics<parallel>], iteration_bounds = array<i64: 1>, scalar_prefetch = 0 : i64, scratch_operands = 0 : i64, tpu.core_type = #tpu.core_type<tc>, window_params = [{transform_indices = @transform_0, window_bounds = array<i64: 8, 256>}, {transform_indices = @transform_1, window_bounds = array<i64: 1, 8>}]} {
    %c0 = arith.constant 0 : index
    %c0_0 = arith.constant 0 : index
    %0 = vector.load %arg1[%c0, %c0_0] : memref<8x256xf32, #tpu.memory_space<vmem>>, vector<8x256xf32>
    %cst = arith.constant 1.000000e+00 : f32
    %1 = vector.broadcast %cst : f32 to vector<1x256xf32>
    %cst_1 = arith.constant dense<0.000000e+00> : vector<1x8xf32>
    %2 = tpu.matmul %1, %0, %cst_1 {dimension_numbers = #tpu.dot_dimension_numbers<[1], [1], [0], [0], [0, 0, 1, 0], [], []>, precision = #tpu.contract_precision<fp32>} : vector<1x256xf32>, vector<8x256xf32>, vector<1x8xf32> -> vector<1x8xf32>
    %cst_2 = arith.constant 3.906250e-03 : f32
    %3 = vector.broadcast %cst_2 : f32 to vector<1x8xf32>
    %4 = arith.mulf %2, %3 : vector<1x8xf32>
    %c0_3 = arith.constant 0 : index
    %c0_4 = arith.constant 0 : index
    %5 = vector.load %arg2[%c0_3, %c0_4] : memref<1x8xf32, #tpu.memory_space<vmem>>, vector<1x8xf32>
    tpu.vector_store %arg2[%c0_3, %c0_4], %4 {strides = array<i32>} : memref<1x8xf32, #tpu.memory_space<vmem>>, vector<1x8xf32>,
    return
  }
  func.func @transform_0(%arg0: i32) -> (i32, i32) {
    %c0_i32 = arith.constant 0 : i32
    %c0_i32_0 = arith.constant 0 : i32
    return %arg0, %c0_i32 : i32, i32
  }
  func.func @transform_1(%arg0: i32) -> (i32, i32) {
    %c0_i32 = arith.constant 0 : i32
    %c0_i32_0 = arith.constant 0 : i32
    return %c0_i32, %arg0 : i32, i32
  }
}

</mosaic_0001>

<bundles_post_ra>
// kernel: tpu_custom_call.1
= control target key start
LH: loop header
LB: loop body
LE: loop exit
PB: predicated region body
PF: predicated region fallthrough
CT: control target
= control target key end

     0   :  { %6 = vsyncpa [#allocation3], 0  ;;  %s586_s0 = inlined_call_operand.hbm [shape: f32[8,256], index: 0, kind: input, shape index: {}]   ;;  %s587_s1 = inlined_call_operand.hbm [shape: f32[1,8], index: 1, kind: output, shape index: {}]  }
   0x1   :  { %7 = vsyncpa [#allocation4], 0  ;;  %s548_s6 = smov [#allocation2]   ;;  %s500_s10 = scalar_lea.hbm %s586_s0, 256 }
   0x2   :  { %s14_s7 = sshll.u32 %s548_s6, 4  ;;  %p501_p0 = scmp.ne.s32.totalorder %s586_s0, %s500_s10  ;;  %s15_s7 = int_to_ptr.vmem [resolvable:$true] %s14_s7 }
   0x3   :  { %p504_p1 = scmp.lt.u32.totalorder %s500_s10, %s586_s0 }
   0x5   :  { %p506_p2 = pnand %p504_p1, %p501_p0 }
   0x7   :  { %509 = shalt.err (!%p506_p2)
}
   0x8   :  { %s510_s15 = scalar_lea.vmem %s15_s7, 256  ;;  %p515_p4 = scmp.lt.s32.totalorder %s15_s7, %s15_s7 }
   0x9   :  { %p511_p3 = scmp.ne.s32.totalorder %s15_s7, %s510_s15  ;;  %p516_p5 = scmp.lt.s32.totalorder %s510_s15, %s510_s15 }
   0xb   :  { %p517_p6 = por %p516_p5, %p515_p4 }
   0xd   :  { %p518_p7 = pnand %p517_p6, %p511_p3 }
   0xf   :  { %521 = shalt.err (!%p518_p7)
}
  0x10   :  { %17 = dma.hbm_to_vmem [thread:$0]  %s586_s0, 256, %s15_s7, [#allocation3]  }
  0x11   :  { %544 = dma.done.wait [#allocation3], 256  }
  0x12   :  { %545 = vsyncadd [#allocation3], 4294967040  ;;  %v549_v0 = vmov 0.0   ;;  %v22_v1 = vld [vmem:[#allocation2 + $0x8] sm:$0xff]  ;;  %v21_v2 = vld [vmem:[#allocation2] sm:$0xff]  ;;  %v550_v11 = vmov 1.0  }
  0x13   :  { %89 = vmatprep.mubr.f32.mxu1 %v549_v0  ;;  %315 = vmatprep.mubr.f32.mxu0 %v549_v0  ;;  %v23_v3 = vand.u32 4294901760, %v22_v1  ;;  %v25_v4 = vand.u32 4294901760, %v21_v2  ;;  %s551_s0 = smov [#allocation5]   ;;  %vm470_vm0 = vcmask 57344  }
  0x14   :  { %s478_s18 = sshll.u32 %s551_s0, 4  ;;  %s479_s18 = int_to_ptr.vmem [resolvable:$true] %s478_s18 }
  0x15   :  { %24 = vmatprep.subr.mxu1 %v23_v3  ;;  %250 = vmatprep.subr.mxu0 %v23_v3  ;;  %v102_v5 = vsub.f32 %v21_v2, %v25_v4  ;;  %v96_v6 = vsub.f32 %v22_v1, %v23_v3  ;;  %s522_s19 = scalar_lea.vmem %s479_s18, 16  ;;  %s526_s20 = scalar_lea.vmem %s479_s18, 32 }
  0x16   :  { %26 = vmatpush1.xpose.msra.mxu1 %v25_v4  ;;  %252 = vmatpush1.xpose.msra.mxu0 %v25_v4  ;;  %p523_p8 = scmp.ne.s32.totalorder %s479_s18, %s522_s19  ;;  %p527_p9 = scmp.lt.s32.totalorder %s479_s18, %s479_s18 }
  0x17   :  { %v97_v7 = vand.u32 4294901760, %v96_v6  ;;  %v103_v8 = vand.u32 4294901760, %v102_v5  ;;  %p528_p10 = scmp.lt.s32.totalorder %s526_s20, %s522_s19 }
  0x19   :  { %90 = vmatmul.mubr.f32.vlgmr.msra.gmra.mrb[0].mxu1 %v549_v0  ;;  %316 = vmatmul.mubr.f32.vlgmr.msra.gmra.mrb[0].mxu0 %v549_v0  ;;  %v98_v9 = vsub.f32 %v96_v6, %v97_v7  ;;  %v104_v10 = vsub.f32 %v102_v5, %v103_v8  ;;  %p529_p11 = por %p528_p10, %p527_p9 }
  0x1a   :  { %324 = vmatprep.subr.mxu0 %v97_v7  ;;  %169 = vmatprep.mubr.f32.mxu1 %v550_v11 }
  0x1b   :  { %v99_v12 = vand.u32 4294901760, %v98_v9  ;;  %v105_v13 = vand.u32 4294901760, %v104_v10  ;;  %328 = vmatpush1.xpose.msra.mxu0 %v103_v8  ;;  %391 = vmatprep.mubr.f32.mxu0 %v550_v11  ;;  %p530_p12 = pnand %p529_p11, %p523_p8 }
  0x1c   :  { %398 = vmatprep.subr.mxu0 %v23_v3 }
  0x1d   :  { %100 = vmatprep.subr.mxu1 %v99_v12 }
  0x1e   :  { %106 = vmatpush1.xpose.msra.mxu1 %v105_v13 }
  0x1f   :  { %177 = vmatprep.subr.mxu1 %v96_v6 }
  0x21   :  { %170 = vmatmul.mubr.f32.vlgmr.msra.gmra.mrb[0].mxu1 %v550_v11  ;;  %392 = vmatmul.mubr.f32.vlgmr.msra.gmra.mrb[0].mxu0 %v550_v11 }
  0x22   :  { %180 = vmatpush1.xpose.msra.mxu1 %v102_v5  ;;  %400 = vmatpush1.xpose.msra.mxu0 %v25_v4 }
  0x23   :  { %243 = vmatprep.mubr.f32.mxu1 %v549_v0  ;;  %463 = vmatprep.mubr.f32.mxu0 %v550_v11 }
  0x29   :  { %244 = vmatmul.mubr.f32.vlgmr.msra.gmra.mrb[0].mxu1 %v549_v0  ;;  %464 = vmatmul.mubr.f32.vlgmr.msra.gmra.mrb[0].mxu0 %v550_v11 }
  0xfc   :  { %v245_v14 = vpop.f32.mrb[0].mxu1  ;;  %v465_v15 = vpop.f32.mrb[0].mxu0 }
  0xfd   :  { %v487_v16 = vadd.f32 %v465_v15, %v245_v14  ;;  %v247_v17 = vpop.f32.mrb[1].mxu1  ;;  %v467_v18 = vpop.f32.mrb[1].mxu0 }
  0xff   :  { %v469_v19 = vmul.f32 0.00390625, %v487_v16 }
 0x101   :  { %471 = vst.msk [vmem:[#allocation5] sm:$0x1] %vm470_vm0, %v469_v19 }
 0x102   :  { %533 = shalt.err (!%p530_p12)
}
 0x103   :  { %s534_s23 = scalar_lea.hbm %s587_s1, 16 }
 0x104   :  { %p535_p13 = scmp.ne.s32.totalorder %s587_s1, %s534_s23  ;;  %p538_p0 = scmp.lt.u32.totalorder %s534_s23, %s587_s1 }
 0x106   :  { %p540_p1 = pnand %p538_p0, %p535_p13 }
 0x108   :  { %543 = shalt.err (!%p540_p1)
}
 0x109   :  { %481 = dma.vmem_to_hbm [thread:$0]  %s479_s18, 16, %s587_s1, [#allocation4]  }
 0x10a   :  { %546 = dma.done.wait [#allocation4], 16  }
 0x10b   :  { %547 = vsyncadd [#allocation4], 4294967280 }
 0x10c   :  { %485 = vsyncpa [#allocation3], 1 }
 0x10d   :  { %486 = vsyncpa [#allocation4], 1 }

</bundles_post_ra>
